<compile_context>
chip_gen: v5e
topology: v5e:2x2
jax: 0.10.0
libtpu: 0.0.40
codegen_flags: <defaults>
</compile_context>

<pallas_src>
import functools

import jax
import jax.numpy as jnp
from jax.experimental import pallas as pl
from jax.experimental.pallas import tpu as pltpu

_LANE = 128
_MAX_LANES = 4096
_MIN_GRID_STEPS = 4                     # >= 2 blocks per TensorCore on v7x (2 TCs)
_ODD_SINGLE_BLOCK_BYTES = 256 * 1024    # raw-byte cap for zero-copy ragged path


def _round_up(a, b):
    return ((a + b - 1) // b) * b


@functools.lru_cache(maxsize=None)
def _tpu_params():
    """Returns (block_bytes, vmem_limit_bytes, native_bf16) per TPU generation."""
    kind = ""
    try:
        kind = jax.devices()[0].device_kind.lower()
    except Exception:
        pass
    vmem_cap = 128 * 1024 * 1024
    try:
        info = pltpu.get_tpu_info()
        vmem_cap = int(getattr(info, "vmem_capacity_bytes", vmem_cap))
    except Exception:
        pass
    if vmem_cap <= 64 * 1024 * 1024:
        # v7x-class: 64 MiB VMEM per TensorCore. Double-buffered in+out is
        # ~4x the block size, so ~6 MiB blocks stay around 24 MiB.
        block_bytes, vmem_limit = 6 * 1024 * 1024, 32 * 1024 * 1024
    else:
        # v5e / v6e: 128 MiB physical VMEM. ~8 MiB blocks (~32 MiB pipelined)
        # amortize the fixed per-grid-step overhead against HBM streaming.
        block_bytes, vmem_limit = 8 * 1024 * 1024, 48 * 1024 * 1024
    # v5e (and older) VPU/EUP have no native bf16; keep the f32 upcast there.
    native_bf16 = not any(v in kind for v in ("v2", "v3", "v4", "v5"))
    return block_bytes, vmem_limit, native_bf16


def _choose_lanes(n, rows_mult):
    """Largest multiple of 128 (<= _MAX_LANES) dividing n, preferring at least
    `rows_mult` rows so sublane packing stays full (8 f32 / 16 bf16 / 32 int8).

    Returns 0 if n is not a multiple of 128 (caller handles the ragged case).
    """
    best_any = 0
    for cand in range(_MAX_LANES, 0, -_LANE):
        if n % cand == 0:
            if best_any == 0:
                best_any = cand
            if n // cand >= rows_mult:
                return cand
    return best_any


def _pick_row_tile(rows, lanes, itemsize, rows_mult, block_bytes):
    """Row-tile sized by bytes, aligned to the sublane packing multiple."""
    tr = max(1, block_bytes // (lanes * itemsize))
    tr = max(rows_mult, (tr // rows_mult) * rows_mult)
    # Keep >= _MIN_GRID_STEPS blocks when rows allow so both v7x TensorCores
    # get >= 2 steps each and can overlap DMA with compute. Harmless on 1-TC chips.
    if rows >= _MIN_GRID_STEPS * rows_mult:
        tr = min(tr, _round_up(pl.cdiv(rows, _MIN_GRID_STEPS), rows_mult))
    if tr >= rows:
        tr = rows  # single full-extent block along rows (always legal)
    return tr


def _sigmoid_kernel(x_ref, o_ref, *, compute_dtype):
    x = x_ref[...]
    if x.dtype != compute_dtype:
        x = x.astype(compute_dtype)
    # sigmoid(x) = 0.5 * (tanh(x/2) + 1): one EUP transcendental, no divide,
    # and it saturates cleanly for large |x| (no exp overflow).
    y = 0.5 * (jnp.tanh(0.5 * x) + 1.0)
    o_ref[...] = y.astype(o_ref.dtype)


def sigmoid_pallas(x, donate_input=False):
    """Sigmoid(x) elementwise via a Pallas TPU kernel. Accepts any shape/rank."""
    orig_shape = x.shape
    in_dtype = x.dtype
    n = int(x.size)
    # torch.sigmoid promotes integer/bool inputs to floating point.
    out_dtype = in_dtype if jnp.issubdtype(in_dtype, jnp.floating) else jnp.float32
    if n == 0:
        return x.astype(out_dtype)

    block_bytes, vmem_limit, native_bf16 = _tpu_params()
    compute_dtype = (
        jnp.bfloat16 if (in_dtype == jnp.bfloat16 and native_bf16) else jnp.float32
    )

    in_itemsize = int(jnp.dtype(in_dtype).itemsize)
    out_itemsize = int(jnp.dtype(out_dtype).itemsize)
    itemsize = max(in_itemsize, out_itemsize)
    rows_mult = max(8, 32 // max(in_itemsize, 1))  # sublane packing multiple

    flat = x.reshape(-1)  # contiguous flatten: metadata only, no HBM copy
    pad = 0
    if n % _LANE == 0:
        lanes = _choose_lanes(n, rows_mult)
        rows = n // lanes
    elif n * itemsize <= _ODD_SINGLE_BLOCK_BYTES:
        # Ragged element count, small/medium tensor: one full-extent (1, n)
        # block. Zero extra HBM traffic (no pad / slice round trip).
        lanes, rows = n, 1
    else:
        # Rare: large tensor whose element count is not a multiple of 128.
        # TODO(synk): replace pad+slice with an in-kernel masked tail store to
        # avoid the extra full-tensor HBM copies.
        lanes = 1024
        pad = _round_up(n, lanes) - n
        flat = jnp.pad(flat, (0, pad))
        rows = flat.size // lanes

    x2 = flat.reshape(rows, lanes)
    tr = _pick_row_tile(rows, lanes, itemsize, rows_mult, block_bytes)
    grid_r = pl.cdiv(rows, tr)  # ragged last row-block handled by Pallas

    aliases = {0: 0} if (donate_input and in_dtype == out_dtype) else {}
    out2 = pl.pallas_call(
        functools.partial(_sigmoid_kernel, compute_dtype=compute_dtype),
        out_shape=jax.ShapeDtypeStruct((rows, lanes), out_dtype),
        grid_spec=pltpu.PrefetchScalarGridSpec(
            num_scalar_prefetch=0,
            grid=(grid_r,),
            in_specs=[pl.BlockSpec((tr, lanes), lambda i: (i, 0))],
            out_specs=pl.BlockSpec((tr, lanes), lambda i: (i, 0)),
        ),
        compiler_params=pltpu.CompilerParams(
            dimension_semantics=("parallel",),
            vmem_limit_bytes=vmem_limit,
        ),
        input_output_aliases=aliases,
    )(x2)

    out_flat = out2.reshape(-1)
    if pad:
        out_flat = out_flat[:n]
    return out_flat.reshape(orig_shape)


# TODO(synk): backward pass (grad_out * sigmoid(x) * (1 - sigmoid(x))) and the
# module's stateful context caching are not implemented; forward only.


if __name__ == "__main__":
    key = jax.random.PRNGKey(0)
    k1, k2, k3 = jax.random.split(key, 3)

    # Small NCHW-like input (batch=2, channels=4, 16x16 spatial).
    x = jax.random.normal(k1, (2, 4, 16, 16), dtype=jnp.float32)
    y = sigmoid_pallas(x)
    jax.block_until_ready(y)
    y_ref = jax.nn.sigmoid(x)
    assert y.shape == x.shape and y.dtype == x.dtype
    assert jnp.max(jnp.abs(y - y_ref)) < 1e-6

    # Moderately sized input: exercises byte-sized row tiles + multi-step grid.
    x_big = jax.random.normal(k2, (256, 512), dtype=jnp.float32)
    y_big = sigmoid_pallas(x_big)
    jax.block_until_ready(y_big)
    assert jnp.max(jnp.abs(y_big - jax.nn.sigmoid(x_big))) < 1e-6

    # Odd element count (not a multiple of 128): zero-copy full-extent block path.
    x_odd = jax.random.normal(k3, (3, 5, 7), dtype=jnp.float32)
    y_odd = sigmoid_pallas(x_odd)
    jax.block_until_ready(y_odd)
    assert y_odd.shape == x_odd.shape
    assert jnp.max(jnp.abs(y_odd - jax.nn.sigmoid(x_odd))) < 1e-6

    # bf16 input: native bf16 compute on v6e/v7x, f32 upcast on v5e.
    x_bf = x.astype(jnp.bfloat16)
    y_bf = sigmoid_pallas(x_bf)
    jax.block_until_ready(y_bf)
    y_bf_ref = jax.nn.sigmoid(x_bf.astype(jnp.float32)).astype(jnp.bfloat16)
    assert y_bf.dtype == jnp.bfloat16
    assert jnp.max(jnp.abs(y_bf.astype(jnp.float32) - y_bf_ref.astype(jnp.float32))) < 2e-2

    # Integer input promotes to float32 (matches torch.sigmoid semantics).
    x_int = jnp.arange(-64, 64, dtype=jnp.int32).reshape(8, 16)
    y_int = sigmoid_pallas(x_int)
    jax.block_until_ready(y_int)
    assert y_int.dtype == jnp.float32
    assert jnp.max(jnp.abs(y_int - jax.nn.sigmoid(x_int.astype(jnp.float32)))) < 1e-6

    # Optional input/output aliasing (caller-donated buffer).
    y_alias = sigmoid_pallas(x + 0.0, donate_input=True)
    jax.block_until_ready(y_alias)
    assert jnp.max(jnp.abs(y_alias - y_ref)) < 1e-6

    print("KERNEL_OK")
</pallas_src>

<mosaic_0001>
module attributes {stable_mosaic.version = 11 : i64} {
  func.func @_sigmoid_kernel(%arg0: i32, %arg1: memref<8x256xf32, #tpu.memory_space<vmem>>, %arg2: memref<8x256xf32, #tpu.memory_space<vmem>>) attributes {dimension_semantics = [#tpu.dimension_semantics<parallel>], iteration_bounds = array<i64: 1>, scalar_prefetch = 0 : i64, scratch_operands = 0 : i64, tpu.core_type = #tpu.core_type<tc>, window_params = [{transform_indices = @transform_0, window_bounds = array<i64: 8, 256>}, {transform_indices = @transform_1, window_bounds = array<i64: 8, 256>}]} {
    %c0 = arith.constant 0 : index
    %c0_0 = arith.constant 0 : index
    %0 = vector.load %arg1[%c0, %c0_0] : memref<8x256xf32, #tpu.memory_space<vmem>>, vector<8x256xf32>
    %cst = arith.constant 5.000000e-01 : f32
    %1 = vector.broadcast %cst : f32 to vector<8x256xf32>
    %2 = arith.mulf %1, %0 : vector<8x256xf32>
    %3 = math.tanh %2 : vector<8x256xf32>
    %cst_1 = arith.constant 1.000000e+00 : f32
    %4 = vector.broadcast %cst_1 : f32 to vector<8x256xf32>
    %5 = arith.addf %3, %4 : vector<8x256xf32>
    %cst_2 = arith.constant 5.000000e-01 : f32
    %6 = vector.broadcast %cst_2 : f32 to vector<8x256xf32>
    %7 = arith.mulf %6, %5 : vector<8x256xf32>
    %c0_3 = arith.constant 0 : index
    %c0_4 = arith.constant 0 : index
    %8 = vector.load %arg2[%c0_3, %c0_4] : memref<8x256xf32, #tpu.memory_space<vmem>>, vector<8x256xf32>
    tpu.vector_store %arg2[%c0_3, %c0_4], %7 {strides = array<i32>} : memref<8x256xf32, #tpu.memory_space<vmem>>, vector<8x256xf32>,
    return
  }
  func.func @transform_0(%arg0: i32) -> (i32, i32) {
    %c0_i32 = arith.constant 0 : i32
    %c0_i32_0 = arith.constant 0 : i32
    return %arg0, %c0_i32 : i32, i32
  }
  func.func @transform_1(%arg0: i32) -> (i32, i32) {
    %c0_i32 = arith.constant 0 : i32
    %c0_i32_0 = arith.constant 0 : i32
    return %arg0, %c0_i32 : i32, i32
  }
}

</mosaic_0001>

<bundles_post_ra>
// kernel: tpu_custom_call.1
= control target key start
LH: loop header
LB: loop body
LE: loop exit
PB: predicated region body
PF: predicated region fallthrough
CT: control target
= control target key end

     0   :  { %6 = vsyncpa [#allocation3], 0  ;;  %s128_s0 = inlined_call_operand.hbm [shape: f32[8,256], index: 0, kind: input, shape index: {}]   ;;  %s129_s1 = inlined_call_operand.hbm [shape: f32[8,256], index: 1, kind: output, shape index: {}]  }
   0x1   :  { %7 = vsyncpa [#allocation4], 0  ;;  %s13_s8 = sshll.u32 %s128_s0, 4  ;;  %s110_s9 = smov [#allocation2]   ;;  %s14_s8 = int_to_ptr.hbm [resolvable:$true] %s13_s8 }
   0x2   :  { %s15_s10 = sshll.u32 %s110_s9, 4  ;;  %s16_s10 = int_to_ptr.vmem [resolvable:$true] %s15_s10 }
   0x3   :  { %18 = dma.hbm_to_vmem [thread:$0]  %s14_s8, 256, %s16_s10, [#allocation3]  }
   0x4   :  { %106 = dma.done.wait [#allocation3], 256  }
   0x5   :  { %107 = vsyncadd [#allocation3], 4294967040  ;;  %v23_v0 = vld [vmem:[#allocation2] sm:$0xff]  ;;  %v24_v1 = vld [vmem:[#allocation2 + $0x8] sm:$0xff]  ;;  %s111_s11 = smov [#allocation5]   ;;  %s42_s14 = sshll.u32 %s129_s1, 4  ;;  %s43_s14 = int_to_ptr.hbm [resolvable:$true] %s42_s14 }
   0x6   :  { %v25_v2 = vmul.f32 0.5, %v23_v0  ;;  %v26_v3 = vmul.f32 0.5, %v24_v1  ;;  %s40_s12 = sshll.u32 %s111_s11, 4  ;;  %s41_s12 = int_to_ptr.vmem [resolvable:$true] %s40_s12 }
   0x8   :  { %54 = vtanh.f32 %v25_v2 }
   0x9   :  { %56 = vtanh.f32 %v26_v3 }
   0xe   :  { %v55_v4 = vpop.eup %54 }
   0xf   :  { %v57_v5 = vpop.eup %56  ;;  %v29_v6 = vadd.f32 1.0, %v55_v4 }
  0x10   :  { %v30_v7 = vadd.f32 1.0, %v57_v5 }
  0x11   :  { %v31_v8 = vmul.f32 0.5, %v29_v6 }
  0x12   :  { %v32_v9 = vmul.f32 0.5, %v30_v7 }
  0x13   :  { %33 = vst [vmem:[#allocation5] sm:$0xff] %v31_v8 }
  0x14   :  { %34 = vst [vmem:[#allocation5 + $0x8] sm:$0xff] %v32_v9 }
  0x15   :  { %45 = dma.vmem_to_hbm [thread:$0]  %s41_s12, 256, %s43_s14, [#allocation4]  }
  0x16   :  { %108 = dma.done.wait [#allocation4], 256  }
  0x17   :  { %109 = vsyncadd [#allocation4], 4294967040 }
  0x18   :  { %50 = vsyncpa [#allocation3], 1 }
  0x19   :  { %51 = vsyncpa [#allocation4], 1 }

</bundles_post_ra>
